<compile_context>
chip_gen: v6e
topology: v6e:2x2x1
jax: 0.10.0
libtpu: 0.0.40
codegen_flags: <defaults>
</compile_context>

<pallas_src>
import functools

import jax
import jax.numpy as jnp
from jax.experimental import pallas as pl
from jax.experimental.pallas import tpu as pltpu


def _round_up(x, m):
    return (x + m - 1) // m * m


# ----------------------------- Pallas kernel ---------------------------------
def _patch_embed_ln_kernel(p_ref, w_ref, b_ref, g_ref, beta_ref, o_ref, *, e_real):
    # p_ref: (tm, Kp)  w_ref: (Kp, Ep)  b/g/beta: (1, Ep) f32  o_ref: (tm, Ep)
    y = jnp.dot(p_ref[...], w_ref[...], preferred_element_type=jnp.float32)
    y = y + b_ref[...]                                   # conv bias (padded lanes are 0)

    e_pad = y.shape[-1]
    inv_n = jnp.float32(1.0 / e_real)
    # Padded lanes of y are exactly 0 (zero weight columns + zero bias), so the
    # plain row-sum already equals the sum over the real embedding dim.
    mean = jnp.sum(y, axis=-1, keepdims=True) * inv_n
    d = y - mean
    if e_pad != e_real:                                  # static: mask pads out of the variance
        lane = jax.lax.broadcasted_iota(jnp.int32, (1, e_pad), 1)
        d = jnp.where(lane < e_real, d, 0.0)
    var = jnp.sum(d * d, axis=-1, keepdims=True) * inv_n
    inv = jax.lax.rsqrt(var + jnp.float32(1e-5))
    # Padded gamma/beta are 0, so padded output lanes are 0 and sliced off on host.
    o_ref[...] = (d * inv * g_ref[...] + beta_ref[...]).astype(o_ref.dtype)


def _proj_layernorm_pallas(patches, w_mat, bias, gamma, beta, *,
                           compute_dtype=jnp.bfloat16, out_dtype=jnp.float32,
                           tm_max=512):
    M, K = patches.shape
    E = w_mat.shape[1]

    Kp = _round_up(K, 128)                 # lane-dense MXU contraction dim
    Ep = _round_up(E, 128)                 # lane-dense output / LN dim
    tm = min(tm_max, _round_up(M, 8))      # big row tile, multiple of 8
    Mp = _round_up(M, tm)                  # decouple tile choice from M

    p = jnp.pad(patches, ((0, Mp - M), (0, Kp - K))).astype(compute_dtype)
    w = jnp.pad(w_mat, ((0, Kp - K), (0, Ep - E))).astype(compute_dtype)
    b = jnp.pad(bias, (0, Ep - E)).reshape(1, Ep).astype(jnp.float32)
    g = jnp.pad(gamma, (0, Ep - E)).reshape(1, Ep).astype(jnp.float32)
    be = jnp.pad(beta, (0, Ep - E)).reshape(1, Ep).astype(jnp.float32)

    kernel = functools.partial(_patch_embed_ln_kernel, e_real=E)
    out = pl.pallas_call(
        kernel,
        out_shape=jax.ShapeDtypeStruct((Mp, Ep), out_dtype),
        grid=(Mp // tm,),
        in_specs=[
            pl.BlockSpec((tm, Kp), lambda i: (i, 0)),   # im2col patch rows (pipelined)
            pl.BlockSpec((Kp, Ep), lambda i: (0, 0)),   # projection weight (resident)
            pl.BlockSpec((1, Ep), lambda i: (0, 0)),    # conv bias
            pl.BlockSpec((1, Ep), lambda i: (0, 0)),    # LN gamma
            pl.BlockSpec((1, Ep), lambda i: (0, 0)),    # LN beta
        ],
        out_specs=pl.BlockSpec((tm, Ep), lambda i: (i, 0)),
        compiler_params=pltpu.CompilerParams(
            dimension_semantics=("parallel",),          # shards M across v7x's 2 TCs
            vmem_limit_bytes=48 * 1024 * 1024,          # within v7x's 64 MiB VMEM
        ),
    )(p, w, b, g, be)
    return out[:M, :E]


# ------------------------------ host-side glue --------------------------------
def _extract_patches(x_nchw, kh, kw, stride, ph, pw):
    # Single XLA op; output channel layout is (c, kh, kw), matching
    # conv_w.reshape(E, C*kh*kw).  HIGHEST precision keeps the extraction exact.
    patches = jax.lax.conv_general_dilated_patches(
        x_nchw, filter_shape=(kh, kw), window_strides=(stride, stride),
        padding=((ph, ph), (pw, pw)), precision=jax.lax.Precision.HIGHEST)
    B, K, Ho, Wo = patches.shape                         # [B, C*kh*kw, Ho, Wo]
    patches = jnp.transpose(patches, (0, 2, 3, 1)).reshape(B * Ho * Wo, K)
    return patches, Ho, Wo


def overlap_patch_embed(x_nchw, conv_w, conv_b, ln_g, ln_b, *, patch_size, stride,
                        compute_dtype=jnp.bfloat16):
    """Equivalent of OverlapPatchEmbed.forward.

    x_nchw : [B, C, H, W]   conv_w : [E, C, kh, kw]   Returns (x, h, w), x: [B, Ho*Wo, E].
    """
    kh, kw = patch_size
    ph, pw = kh // 2, kw // 2
    B, C, H, W = x_nchw.shape
    E = conv_w.shape[0]

    patches, Ho, Wo = _extract_patches(x_nchw, kh, kw, stride, ph, pw)   # [M, C*kh*kw]
    w_mat = conv_w.reshape(E, C * kh * kw).T                             # [K, E], K=(c,kh,kw)

    out = _proj_layernorm_pallas(patches, w_mat, conv_b, ln_g, ln_b,
                                 compute_dtype=compute_dtype)            # [M, E]
    return out.reshape(B, Ho * Wo, E), Ho, Wo


# ------------------------------- reference ------------------------------------
def _reference(x_nchw, conv_w, conv_b, ln_g, ln_b, *, patch_size, stride):
    kh, kw = patch_size
    ph, pw = kh // 2, kw // 2
    y = jax.lax.conv_general_dilated(
        x_nchw, conv_w, window_strides=(stride, stride),
        padding=[(ph, ph), (pw, pw)],
        dimension_numbers=("NCHW", "OIHW", "NCHW"),
        precision=jax.lax.Precision.HIGHEST,
    ) + conv_b[None, :, None, None]
    B, E, Ho, Wo = y.shape
    y = jnp.transpose(y, (0, 2, 3, 1)).reshape(B, Ho * Wo, E)   # b (h w) c
    mean = jnp.mean(y, axis=-1, keepdims=True)
    var = jnp.mean((y - mean) ** 2, axis=-1, keepdims=True)
    y = (y - mean) * jax.lax.rsqrt(var + 1e-5) * ln_g + ln_b
    return y, Ho, Wo


# --------------------------------- main ----------------------------------------
if __name__ == "__main__":
    # SegFormer stage-1-like hyperparams, small shapes
    B, C, H, W = 2, 4, 16, 16
    patch_size = (7, 7)
    stride = 4
    E = 32

    key = jax.random.PRNGKey(0)
    kx, kw_, kb, kg, kbeta = jax.random.split(key, 5)
    x = jax.random.normal(kx, (B, C, H, W), jnp.float32)
    conv_w = jax.random.normal(kw_, (E, C, patch_size[0], patch_size[1]), jnp.float32) * 0.05
    conv_b = jax.random.normal(kb, (E,), jnp.float32) * 0.05
    ln_g = 1.0 + 0.1 * jax.random.normal(kg, (E,), jnp.float32)
    ln_b = 0.1 * jax.random.normal(kbeta, (E,), jnp.float32)

    ref, rh, rw = _reference(x, conv_w, conv_b, ln_g, ln_b,
                             patch_size=patch_size, stride=stride)

    # f32 operands: tight check of the padded/masked kernel semantics.
    out32, h, w = overlap_patch_embed(x, conv_w, conv_b, ln_g, ln_b,
                                      patch_size=patch_size, stride=stride,
                                      compute_dtype=jnp.float32)
    out32 = jax.block_until_ready(out32)
    assert (h, w) == (rh, rw), (h, w, rh, rw)
    assert out32.shape == ref.shape, (out32.shape, ref.shape)
    assert jnp.allclose(out32, ref, atol=1e-3, rtol=1e-3), \
        float(jnp.max(jnp.abs(out32 - ref)))

    # bf16 operands (fast path): f32 accumulation/LN, looser tolerance.
    outbf, h, w = overlap_patch_embed(x, conv_w, conv_b, ln_g, ln_b,
                                      patch_size=patch_size, stride=stride,
                                      compute_dtype=jnp.bfloat16)
    outbf = jax.block_until_ready(outbf)
    assert (h, w) == (rh, rw), (h, w, rh, rw)
    assert outbf.shape == ref.shape, (outbf.shape, ref.shape)
    assert jnp.allclose(outbf, ref, atol=5e-2, rtol=5e-2), \
        float(jnp.max(jnp.abs(outbf - ref)))

    print("KERNEL_OK")
</pallas_src>

<mosaic_0001>
module attributes {stable_mosaic.version = 11 : i64} {
  func.func @_patch_embed_ln_kernel(%arg0: i32, %arg1: memref<32x256xf32, #tpu.memory_space<vmem>>, %arg2: memref<256x128xf32, #tpu.memory_space<vmem>>, %arg3: memref<1x128xf32, #tpu.memory_space<vmem>>, %arg4: memref<1x128xf32, #tpu.memory_space<vmem>>, %arg5: memref<1x128xf32, #tpu.memory_space<vmem>>, %arg6: memref<32x128xf32, #tpu.memory_space<vmem>>) attributes {dimension_semantics = [#tpu.dimension_semantics<parallel>], iteration_bounds = array<i64: 1>, scalar_prefetch = 0 : i64, scratch_operands = 0 : i64, tpu.core_type = #tpu.core_type<tc>, window_params = [{transform_indices = @transform_0, window_bounds = array<i64: 32, 256>}, {pipeline_mode = #tpu.pipeline_mode<synchronous>, transform_indices = @transform_1, window_bounds = array<i64: 256, 128>}, {pipeline_mode = #tpu.pipeline_mode<synchronous>, transform_indices = @transform_2, window_bounds = array<i64: 1, 128>}, {pipeline_mode = #tpu.pipeline_mode<synchronous>, transform_indices = @transform_3, window_bounds = array<i64: 1, 128>}, {pipeline_mode = #tpu.pipeline_mode<synchronous>, transform_indices = @transform_4, window_bounds = array<i64: 1, 128>}, {transform_indices = @transform_5, window_bounds = array<i64: 32, 128>}]} {
    %c0 = arith.constant 0 : index
    %c0_0 = arith.constant 0 : index
    %0 = vector.load %arg1[%c0, %c0_0] : memref<32x256xf32, #tpu.memory_space<vmem>>, vector<32x256xf32>
    %c0_1 = arith.constant 0 : index
    %c0_2 = arith.constant 0 : index
    %1 = vector.load %arg2[%c0_1, %c0_2] : memref<256x128xf32, #tpu.memory_space<vmem>>, vector<256x128xf32>
    %cst = arith.constant dense<0.000000e+00> : vector<32x128xf32>
    %2 = tpu.matmul %0, %1, %cst {dimension_numbers = #tpu.dot_dimension_numbers<[1], [0], [0], [1], [0, 0, 1, 1], [], []>} : vector<32x256xf32>, vector<256x128xf32>, vector<32x128xf32> -> vector<32x128xf32>
    %c0_3 = arith.constant 0 : index
    %c0_4 = arith.constant 0 : index
    %3 = vector.load %arg3[%c0_3, %c0_4] : memref<1x128xf32, #tpu.memory_space<vmem>>, vector<1x128xf32>
    %4 = vector.broadcast %3 : vector<1x128xf32> to vector<32x128xf32>
    %5 = arith.addf %2, %4 : vector<32x128xf32>
    %cst_5 = arith.constant dense<0.000000e+00> : vector<32xf32>
    %6 = vector.multi_reduction <add>, %5, %cst_5 [1] : vector<32x128xf32> to vector<32xf32>
    %7 = vector.shape_cast %6 : vector<32xf32> to vector<32x1xf32>
    %cst_6 = arith.constant 3.125000e-02 : f32
    %8 = vector.broadcast %cst_6 : f32 to vector<32x1xf32>
    %9 = arith.mulf %7, %8 : vector<32x1xf32>
    %10 = vector.broadcast %9 : vector<32x1xf32> to vector<32x128xf32>
    %11 = arith.subf %5, %10 : vector<32x128xf32>
    %12 = tpu.iota {dimensions = array<i32: 1>} : vector<1x128xi32>
    %c32_i32 = arith.constant 32 : i32
    %13 = vector.broadcast %c32_i32 : i32 to vector<1x128xi32>
    %14 = arith.cmpi slt, %12, %13 : vector<1x128xi32>
    %cst_7 = arith.constant 0.000000e+00 : f32
    %15 = vector.shape_cast %14 : vector<1x128xi1> to vector<1x128xi1>
    %16 = vector.broadcast %15 : vector<1x128xi1> to vector<32x128xi1>
    %17 = vector.broadcast %cst_7 : f32 to vector<32x128xf32>
    %18 = arith.select %16, %11, %17 : vector<32x128xi1>, vector<32x128xf32>
    %19 = arith.mulf %18, %18 : vector<32x128xf32>
    %cst_8 = arith.constant dense<0.000000e+00> : vector<32xf32>
    %20 = vector.multi_reduction <add>, %19, %cst_8 [1] : vector<32x128xf32> to vector<32xf32>
    %21 = vector.shape_cast %20 : vector<32xf32> to vector<32x1xf32>
    %cst_9 = arith.constant 3.125000e-02 : f32
    %22 = vector.broadcast %cst_9 : f32 to vector<32x1xf32>
    %23 = arith.mulf %21, %22 : vector<32x1xf32>
    %cst_10 = arith.constant 9.99999974E-6 : f32
    %24 = vector.broadcast %cst_10 : f32 to vector<32x1xf32>
    %25 = arith.addf %23, %24 : vector<32x1xf32>
    %26 = math.rsqrt %25 : vector<32x1xf32>
    %27 = vector.broadcast %26 : vector<32x1xf32> to vector<32x128xf32>
    %28 = arith.mulf %18, %27 : vector<32x128xf32>
    %c0_11 = arith.constant 0 : index
    %c0_12 = arith.constant 0 : index
    %29 = vector.load %arg4[%c0_11, %c0_12] : memref<1x128xf32, #tpu.memory_space<vmem>>, vector<1x128xf32>
    %30 = vector.broadcast %29 : vector<1x128xf32> to vector<32x128xf32>
    %31 = arith.mulf %28, %30 : vector<32x128xf32>
    %c0_13 = arith.constant 0 : index
    %c0_14 = arith.constant 0 : index
    %32 = vector.load %arg5[%c0_13, %c0_14] : memref<1x128xf32, #tpu.memory_space<vmem>>, vector<1x128xf32>
    %33 = vector.broadcast %32 : vector<1x128xf32> to vector<32x128xf32>
    %34 = arith.addf %31, %33 : vector<32x128xf32>
    %c0_15 = arith.constant 0 : index
    %c0_16 = arith.constant 0 : index
    %35 = vector.load %arg6[%c0_15, %c0_16] : memref<32x128xf32, #tpu.memory_space<vmem>>, vector<32x128xf32>
    tpu.vector_store %arg6[%c0_15, %c0_16], %34 {strides = array<i32>} : memref<32x128xf32, #tpu.memory_space<vmem>>, vector<32x128xf32>,
    return
  }
  func.func @transform_0(%arg0: i32) -> (i32, i32) {
    %c0_i32 = arith.constant 0 : i32
    %c0_i32_0 = arith.constant 0 : i32
    return %arg0, %c0_i32 : i32, i32
  }
  func.func @transform_1(%arg0: i32) -> (i32, i32) {
    %c0_i32 = arith.constant 0 : i32
    %c0_i32_0 = arith.constant 0 : i32
    %c0_i32_1 = arith.constant 0 : i32
    return %c0_i32, %c0_i32_0 : i32, i32
  }
  func.func @transform_2(%arg0: i32) -> (i32, i32) {
    %c0_i32 = arith.constant 0 : i32
    %c0_i32_0 = arith.constant 0 : i32
    %c0_i32_1 = arith.constant 0 : i32
    return %c0_i32, %c0_i32_0 : i32, i32
  }
  func.func @transform_3(%arg0: i32) -> (i32, i32) {
    %c0_i32 = arith.constant 0 : i32
    %c0_i32_0 = arith.constant 0 : i32
    %c0_i32_1 = arith.constant 0 : i32
    return %c0_i32, %c0_i32_0 : i32, i32
  }
  func.func @transform_4(%arg0: i32) -> (i32, i32) {
    %c0_i32 = arith.constant 0 : i32
    %c0_i32_0 = arith.constant 0 : i32
    %c0_i32_1 = arith.constant 0 : i32
    return %c0_i32, %c0_i32_0 : i32, i32
  }
  func.func @transform_5(%arg0: i32) -> (i32, i32) {
    %c0_i32 = arith.constant 0 : i32
    %c0_i32_0 = arith.constant 0 : i32
    return %arg0, %c0_i32 : i32, i32
  }
}

</mosaic_0001>

<bundles_post_ra>
// kernel: tpu_custom_call.1
= control target key start
LH: loop header
LB: loop body
LE: loop exit
PB: predicated region body
PF: predicated region fallthrough
CT: control target
= control target key end

     0   :  { %10 = vsyncpa [#allocation3], 0  ;;  %s503_s0 = inlined_call_operand.hbm [shape: f32[32,256], index: 0, kind: input, shape index: {}]   ;;  %s504_s1 = inlined_call_operand.hbm [shape: f32[256,128], index: 1, kind: input, shape index: {}]   ;;  %s505_s2 = inlined_call_operand.vmem [shape: f32[1,128], index: 2, kind: input, shape index: {}]   ;;  %s506_s3 = inlined_call_operand.vmem [shape: f32[1,128], index: 3, kind: input, shape index: {}]   ;;  %s507_s4 = inlined_call_operand.vmem [shape: f32[1,128], index: 4, kind: input, shape index: {}]   ;;  %s508_s5 = inlined_call_operand.hbm [shape: f32[32,128], index: 5, kind: output, shape index: {}]  }
   0x1   :  { %11 = vsyncpa [#allocation6], 0 }
   0x2   :  { %12 = vsyncpa [#allocation4], 0  ;;  %s438_s18 = smov [#allocation2]  }
   0x3   :  { %s18_s19 = sshll.u32 %s438_s18, 4  ;;  %s19_s19 = int_to_ptr.vmem [resolvable:$true] %s18_s19 }
   0x4   :  { %s380_s20 = scalar_lea.vmem %s19_s19, 1024  ;;  %p385_p1 = scmp.lt.s32.totalorder %s19_s19, %s19_s19 }
   0x5   :  { %p381_p0 = scmp.ne.s32.totalorder %s19_s19, %s380_s20  ;;  %p386_p2 = scmp.lt.s32.totalorder %s380_s20, %s380_s20 }
   0x7   :  { %p387_p3 = por %p386_p2, %p385_p1 }
   0x9   :  { %p388_p4 = pnand %p387_p3, %p381_p0 }
   0xb   :  { %391 = shalt.err (!%p388_p4)
}
   0xc   :  { %s439_s21 = smov 256   ;;  %s440_s22 = smov 16  }
   0xd   :  { %24 = dma.hbm_to_vmem [thread:$0]  %s503_s0, 1024, %s19_s19, [#allocation3], %s439_s21, %s439_s21, %s440_s22  }
   0xe   :  { %s441_s25 = smov [#allocation5]  }
   0xf   :  { %s30_s26 = sshll.u32 %s441_s25, 4  ;;  %s31_s26 = int_to_ptr.vmem [resolvable:$true] %s30_s26 }
  0x10   :  { %s400_s27 = scalar_lea.vmem %s31_s26, 4096  ;;  %p405_p6 = scmp.lt.s32.totalorder %s31_s26, %s31_s26 }
  0x11   :  { %p401_p5 = scmp.ne.s32.totalorder %s31_s26, %s400_s27  ;;  %p406_p7 = scmp.lt.s32.totalorder %s400_s27, %s400_s27 }
  0x13   :  { %p407_p8 = por %p406_p7, %p405_p6 }
  0x15   :  { %p408_p9 = pnand %p407_p8, %p401_p5 }
  0x17   :  { %411 = shalt.err (!%p408_p9)
}
  0x18   :  { %s442_s28 = smov 128   ;;  %s443_s29 = smov 8  }
  0x19   :  { %36 = dma.hbm_to_vmem [thread:$0]  %s504_s1, 4096, %s31_s26, [#allocation6], %s442_s28, %s442_s28, %s443_s29  }
  0x1a   :  { %432 = dma.done.wait [#allocation3], 1024  }
  0x1b   :  { %433 = vsyncadd [#allocation3], 4294966272 }
  0x1c   :  { %434 = dma.done.wait [#allocation6], 4096  }
  0x1d   :  { %435 = vsyncadd [#allocation6], 4294963200  ;;  %v88_v0 = vld [vmem:[#allocation5 + $0xf8] sm:$0xff]  ;;  %v87_v2 = vld [vmem:[#allocation5 + $0xf0] sm:$0xff]  ;;  %v197_v57 = vlaneseq  ;;  %s444_s10 = smov [#allocation7]  }
  0x1e   :  { %v72_v1 = vld [vmem:[#allocation5 + $0x78] sm:$0xff]  ;;  %281 = vmatprep.subr.mxu0 %v88_v0  ;;  %325 = vmatprep.subr.mxu1 %v88_v0  ;;  %v71_v3 = vld [vmem:[#allocation5 + $0x70] sm:$0xff]  ;;  %v86_v4 = vld [vmem:[#allocation5 + $0xe8] sm:$0xff] }
  0x1f   :  { %282 = vmatpush3.msra.mxu0 %v72_v1  ;;  %341 = vmatpush3.msra.mxu1 %v72_v1  ;;  %v70_v5 = vld [vmem:[#allocation5 + $0x68] sm:$0xff]  ;;  %v85_v6 = vld [vmem:[#allocation5 + $0xe0] sm:$0xff]  ;;  %v84_v8 = vld [vmem:[#allocation5 + $0xd8] sm:$0xff]  ;;  %v198_v58 = vand.u32 127, %v197_v57 }
  0x20   :  { %283 = vmatprep.subr.mxu0 %v87_v2  ;;  %326 = vmatprep.subr.mxu1 %v87_v2  ;;  %v69_v7 = vld [vmem:[#allocation5 + $0x60] sm:$0xff]  ;;  %v68_v9 = vld [vmem:[#allocation5 + $0x58] sm:$0xff]  ;;  %v83_v10 = vld [vmem:[#allocation5 + $0xd0] sm:$0xff] }
  0x21   :  { %284 = vmatpush3.msra.mxu0 %v71_v3  ;;  %342 = vmatpush3.msra.mxu1 %v71_v3  ;;  %v67_v11 = vld [vmem:[#allocation5 + $0x50] sm:$0xff]  ;;  %v82_v12 = vld [vmem:[#allocation5 + $0xc8] sm:$0xff]  ;;  %v81_v14 = vld [vmem:[#allocation5 + $0xc0] sm:$0xff]  ;;  %vm199_vm0 = vcmp.lt.s32.totalorder %v198_v58, 32 }
  0x22   :  { %285 = vmatprep.subr.mxu0 %v86_v4  ;;  %327 = vmatprep.subr.mxu1 %v86_v4  ;;  %v66_v13 = vld [vmem:[#allocation5 + $0x48] sm:$0xff]  ;;  %v65_v15 = vld [vmem:[#allocation5 + $0x40] sm:$0xff]  ;;  %v80_v16 = vld [vmem:[#allocation5 + $0xb8] sm:$0xff] }
  0x23   :  { %286 = vmatpush3.msra.mxu0 %v70_v5  ;;  %343 = vmatpush3.msra.mxu1 %v70_v5  ;;  %v64_v17 = vld [vmem:[#allocation5 + $0x38] sm:$0xff]  ;;  %v79_v18 = vld [vmem:[#allocation5 + $0xb0] sm:$0xff]  ;;  %v78_v20 = vld [vmem:[#allocation5 + $0xa8] sm:$0xff] }
  0x24   :  { %287 = vmatprep.subr.mxu0 %v85_v6  ;;  %328 = vmatprep.subr.mxu1 %v85_v6  ;;  %v63_v19 = vld [vmem:[#allocation5 + $0x30] sm:$0xff]  ;;  %v62_v21 = vld [vmem:[#allocation5 + $0x28] sm:$0xff]  ;;  %v77_v22 = vld [vmem:[#allocation5 + $0xa0] sm:$0xff] }
  0x25   :  { %288 = vmatpush3.msra.mxu0 %v69_v7  ;;  %344 = vmatpush3.msra.mxu1 %v69_v7  ;;  %v61_v23 = vld [vmem:[#allocation5 + $0x20] sm:$0xff]  ;;  %v76_v24 = vld [vmem:[#allocation5 + $0x98] sm:$0xff]  ;;  %v75_v26 = vld [vmem:[#allocation5 + $0x90] sm:$0xff] }
  0x26   :  { %289 = vmatprep.subr.mxu0 %v84_v8  ;;  %329 = vmatprep.subr.mxu1 %v84_v8  ;;  %v60_v25 = vld [vmem:[#allocation5 + $0x18] sm:$0xff]  ;;  %v59_v27 = vld [vmem:[#allocation5 + $0x10] sm:$0xff]  ;;  %v74_v28 = vld [vmem:[#allocation5 + $0x88] sm:$0xff] }
  0x27   :  { %290 = vmatpush3.msra.mxu0 %v68_v9  ;;  %345 = vmatpush3.msra.mxu1 %v68_v9  ;;  %v58_v29 = vld [vmem:[#allocation5 + $0x8] sm:$0xff]  ;;  %v73_v30 = vld [vmem:[#allocation5 + $0x80] sm:$0xff]  ;;  %v52_v36 = vld [vmem:[#allocation2 + $0x18] sm:$0xff] }
  0x28   :  { %291 = vmatprep.subr.mxu0 %v83_v10  ;;  %330 = vmatprep.subr.mxu1 %v83_v10  ;;  %v57_v31 = vld [vmem:[#allocation5] sm:$0xff]  ;;  %v50_v32 = vld [vmem:[#allocation2 + $0x8] sm:$0xff]  ;;  %v56_v37 = vld [vmem:[#allocation2 + $0x38] sm:$0xff] }
  0x29   :  { %292 = vmatpush3.msra.mxu0 %v67_v11  ;;  %346 = vmatpush3.msra.mxu1 %v67_v11  ;;  %v54_v33 = vld [vmem:[#allocation2 + $0x28] sm:$0xff]  ;;  %v49_v34 = vld [vmem:[#allocation2] sm:$0xff]  ;;  %v51_v38 = vld [vmem:[#allocation2 + $0x10] sm:$0xff] }
  0x2a   :  { %293 = vmatprep.subr.mxu0 %v82_v12  ;;  %331 = vmatprep.subr.mxu1 %v82_v12  ;;  %v53_v35 = vld [vmem:[#allocation2 + $0x20] sm:$0xff]  ;;  %v55_v39 = vld [vmem:[#allocation2 + $0x30] sm:$0xff] }
  0x2b   :  { %294 = vmatpush3.msra.mxu0 %v66_v13  ;;  %347 = vmatpush3.msra.mxu1 %v66_v13  ;;  %v278_v44 = vld [vmem:[%s505_s2] ss:$0 sm:$0xff] }
  0x2c   :  { %295 = vmatprep.subr.mxu0 %v81_v14  ;;  %332 = vmatprep.subr.mxu1 %v81_v14 }
  0x2d   :  { %296 = vmatpush3.msra.mxu0 %v65_v15  ;;  %348 = vmatpush3.msra.mxu1 %v65_v15 }
  0x2e   :  { %297 = vmatprep.subr.mxu0 %v80_v16  ;;  %333 = vmatprep.subr.mxu1 %v80_v16 }
  0x2f   :  { %298 = vmatpush3.msra.mxu0 %v64_v17  ;;  %349 = vmatpush3.msra.mxu1 %v64_v17 }
  0x30   :  { %299 = vmatprep.subr.mxu0 %v79_v18  ;;  %334 = vmatprep.subr.mxu1 %v79_v18 }
  0x31   :  { %300 = vmatpush3.msra.mxu0 %v63_v19  ;;  %350 = vmatpush3.msra.mxu1 %v63_v19 }
  0x32   :  { %301 = vmatprep.subr.mxu0 %v78_v20  ;;  %335 = vmatprep.subr.mxu1 %v78_v20 }
  0x33   :  { %302 = vmatpush3.msra.mxu0 %v62_v21  ;;  %351 = vmatpush3.msra.mxu1 %v62_v21 }
  0x34   :  { %303 = vmatprep.subr.mxu0 %v77_v22  ;;  %336 = vmatprep.subr.mxu1 %v77_v22 }
  0x35   :  { %304 = vmatpush3.msra.mxu0 %v61_v23  ;;  %352 = vmatpush3.msra.mxu1 %v61_v23 }
  0x36   :  { %305 = vmatprep.subr.mxu0 %v76_v24  ;;  %337 = vmatprep.subr.mxu1 %v76_v24 }
  0x37   :  { %306 = vmatpush3.msra.mxu0 %v60_v25  ;;  %353 = vmatpush3.msra.mxu1 %v60_v25 }
  0x38   :  { %307 = vmatprep.subr.mxu0 %v75_v26  ;;  %338 = vmatprep.subr.mxu1 %v75_v26 }
  0x39   :  { %308 = vmatpush3.msra.mxu0 %v59_v27  ;;  %354 = vmatpush3.msra.mxu1 %v59_v27 }
  0x3a   :  { %309 = vmatprep.subr.mxu0 %v74_v28  ;;  %339 = vmatprep.subr.mxu1 %v74_v28  ;;  %v279_v28 = vld [vmem:[%s506_s3] ss:$0 sm:$0xff]  ;;  %s265_s3 = sshll.u32 %s444_s10, 4  ;;  %s266_s3 = int_to_ptr.vmem [resolvable:$true] %s265_s3 }
  0x3b   :  { %310 = vmatpush3.msra.mxu0 %v58_v29  ;;  %355 = vmatpush3.msra.mxu1 %v58_v29  ;;  %p417_p11 = scmp.lt.s32.totalorder %s266_s3, %s266_s3 }
  0x3c   :  { %311 = vmatprep.subr.mxu0 %v73_v30  ;;  %340 = vmatprep.subr.mxu1 %v73_v30  ;;  %v280_v30 = vld [vmem:[%s507_s4] ss:$0 sm:$0xff]  ;;  %s412_s4 = scalar_lea.vmem %s266_s3, 512 }
  0x3d   :  { %312 = vmatpush3.msra.mxu0 %v57_v31  ;;  %356 = vmatpush3.msra.mxu1 %v57_v31  ;;  %p413_p10 = scmp.ne.s32.totalorder %s266_s3, %s412_s4  ;;  %p418_p12 = scmp.lt.s32.totalorder %s412_s4, %s412_s4 }
  0x3e   :  { %160 = vmatprep.mubr.f32.mxu0 %v50_v32  ;;  %170 = vmatprep.mubr.f32.mxu1 %v54_v33 }
  0x3f   :  { %161 = vmatmul.mubr.f32.vlgmr.msra.gmra.mxu0 %v49_v34  ;;  %171 = vmatmul.mubr.f32.vlgmr.msra.gmra.mxu1 %v53_v35  ;;  %p419_p13 = por %p418_p12, %p417_p11 }
  0x40   :  { %165 = vmatprep.mubr.f32.mxu0 %v52_v36  ;;  %175 = vmatprep.mubr.f32.mxu1 %v56_v37 }
  0x41   :  { %p420_p0 = pnand %p419_p13, %p413_p10 }
  0x43   :  { %166 = vmatmul.mubr.f32.gmra.mxu0 %v51_v38  ;;  %176 = vmatmul.mubr.f32.gmra.mxu1 %v55_v39 }
  0xff   :  { %v313_v40 = vpop.f32.mrf.mxu0  ;;  %v319_v41 = vpop.f32.mrf.mxu1 }
 0x101   :  { %v314_v42 = vpop.f32.mrf.mxu0  ;;  %v320_v43 = vpop.f32.mrf.mxu1 }
 0x102   :  { %v315_v45 = vadd.f32 %v314_v42, %v313_v40  ;;  %v321_v46 = vadd.f32 %v320_v43, %v319_v41 }
 0x103   :  { %v316_v47 = vpop.f32.mrf.mxu0  ;;  %v322_v48 = vpop.f32.mrf.mxu1 }
 0x104   :  { %v173_v49 = vadd.f32 %v321_v46, %v278_v44  ;;  %v163_v50 = vadd.f32 %v315_v45, %v278_v44 }
 0x105   :  { %v317_v51 = vpop.f32.mrf.mxu0  ;;  %v323_v52 = vpop.f32.mrf.mxu1 }
 0x106   :  { %v318_v53 = vadd.f32 %v317_v51, %v316_v47  ;;  %v324_v54 = vadd.f32 %v323_v52, %v322_v48  ;;  %185 = vadd.xlane.f32.xlu1 %v173_v49  ;;  %181 = vadd.xlane.f32.xlu0 %v163_v50 }
 0x108   :  { %v178_v55 = vadd.f32 %v324_v54, %v278_v44  ;;  %v168_v56 = vadd.f32 %v318_v53, %v278_v44 }
 0x10a   :  { %187 = vadd.xlane.f32.xlu1 %v178_v55  ;;  %183 = vadd.xlane.f32.xlu0 %v168_v56 }
 0x18f   :  { %v186_v59 = vpop.xlane.xlu1 %185  ;;  %v182_v60 = vpop.xlane.xlu0 %181 }
 0x190   :  { %v191_v61 = vmul.f32 0.03125, %v186_v59  ;;  %v189_v62 = vmul.f32 0.03125, %v182_v60 }
 0x192   :  { %v195_v63 = vsub.f32 %v173_v49, %v191_v61  ;;  %v193_v0 = vsub.f32 %v163_v50, %v189_v62 }
 0x193   :  { %v188_v1 = vpop.xlane.xlu1 %187  ;;  %v184_v2 = vpop.xlane.xlu0 %183 }
 0x194   :  { %v192_v3 = vmul.f32 0.03125, %v188_v1  ;;  %v190_v4 = vmul.f32 0.03125, %v184_v2  ;;  %v202_v5 = vsel %vm199_vm0, %v193_v0, 0.0  ;;  %v204_v9 = vsel %vm199_vm0, %v195_v63, 0.0 }
 0x195   :  { %v206_v6 = vmul.f32 %v202_v5, %v202_v5  ;;  %v208_v11 = vmul.f32 %v204_v9, %v204_v9 }
 0x196   :  { %v196_v7 = vsub.f32 %v178_v55, %v192_v3  ;;  %v194_v8 = vsub.f32 %v168_v56, %v190_v4 }
 0x197   :  { %210 = vadd.xlane.f32.xlu0 %v206_v6 }
 0x198   :  { %v203_v10 = vsel %vm199_vm0, %v194_v8, 0.0  ;;  %v205_v13 = vsel %vm199_vm0, %v196_v7, 0.0 }
 0x199   :  { %v207_v12 = vmul.f32 %v203_v10, %v203_v10  ;;  %v209_v14 = vmul.f32 %v205_v13, %v205_v13 }
 0x19b   :  { %214 = vadd.xlane.f32.xlu0 %v208_v11  ;;  %212 = vadd.xlane.f32.xlu1 %v207_v12 }
 0x19f   :  { %216 = vadd.xlane.f32.xlu1 %v209_v14 }
 0x220   :  { %v211_v15 = vpop.xlane.xlu0 %210 }
 0x221   :  { %v218_v16 = vmul.f32 0.03125, %v211_v15 }
 0x223   :  { %v222_v17 = vadd.f32 1e-05, %v218_v16 }
 0x224   :  { %v213_v18 = vpop.xlane.xlu1 %212  ;;  %v215_v19 = vpop.xlane.xlu0 %214 }
 0x225   :  { %364 = vrsqrt.f32 %v222_v17  ;;  %v219_v20 = vmul.f32 0.03125, %v213_v18  ;;  %v220_v21 = vmul.f32 0.03125, %v215_v19 }
 0x227   :  { %v223_v22 = vadd.f32 1e-05, %v219_v20  ;;  %v224_v23 = vadd.f32 1e-05, %v220_v21 }
 0x228   :  { %v217_v24 = vpop.xlane.xlu1 %216 }
 0x229   :  { %366 = vrsqrt.f32 %v223_v22  ;;  %v221_v25 = vmul.f32 0.03125, %v217_v24 }
 0x22a   :  { %368 = vrsqrt.f32 %v224_v23 }
 0x22b   :  { %v225_v26 = vadd.f32 1e-05, %v221_v25 }
 0x22d   :  { %370 = vrsqrt.f32 %v225_v26 }
 0x232   :  { %v365_v27 = vpop.eup %364 }
 0x233   :  { %v230_v29 = vmul.f32 %v365_v27, %v202_v5 }
 0x235   :  { %v241_v31 = vmul.f32 %v279_v28, %v230_v29 }
 0x236   :  { %v367_v32 = vpop.eup %366 }
 0x237   :  { %v369_v33 = vpop.eup %368  ;;  %v231_v34 = vmul.f32 %v367_v32, %v203_v10  ;;  %v252_v35 = vadd.f32 %v280_v30, %v241_v31 }
 0x238   :  { %v232_v36 = vmul.f32 %v369_v33, %v204_v9 }
 0x239   :  { %v242_v37 = vmul.f32 %v279_v28, %v231_v34  ;;  %256 = vst [vmem:[#allocation7] sm:$0xff] %v252_v35 }
 0x23a   :  { %v371_v38 = vpop.eup %370  ;;  %v243_v39 = vmul.f32 %v279_v28, %v232_v36 }
 0x23b   :  { %v233_v40 = vmul.f32 %v371_v38, %v205_v13  ;;  %v253_v41 = vadd.f32 %v280_v30, %v242_v37 }
 0x23c   :  { %v254_v42 = vadd.f32 %v280_v30, %v243_v39 }
 0x23d   :  { %v244_v43 = vmul.f32 %v279_v28, %v233_v40  ;;  %257 = vst [vmem:[#allocation7 + $0x8] sm:$0xff] %v253_v41 }
 0x23e   :  { %258 = vst [vmem:[#allocation7 + $0x10] sm:$0xff] %v254_v42 }
 0x23f   :  { %v255_v44 = vadd.f32 %v280_v30, %v244_v43 }
 0x241   :  { %259 = vst [vmem:[#allocation7 + $0x18] sm:$0xff] %v255_v44 }
 0x242   :  { %423 = shalt.err (!%p420_p0)
}
 0x243   :  { %271 = dma.vmem_to_hbm [thread:$0]  %s266_s3, 512, %s508_s5, [#allocation4], %s442_s28, %s442_s28, %s443_s29  }
 0x244   :  { %436 = dma.done.wait [#allocation4], 512  }
 0x245   :  { %437 = vsyncadd [#allocation4], 4294966784 }
 0x246   :  { %275 = vsyncpa [#allocation3], 1 }
 0x247   :  { %276 = vsyncpa [#allocation6], 1 }
 0x248   :  { %277 = vsyncpa [#allocation4], 1 }

</bundles_post_ra>
